<compile_context>
chip_gen: v6e
topology: v6e:2x2x1
jax: 0.10.0
libtpu: 0.0.40
codegen_flags: <defaults>
</compile_context>

<pallas_src>
import functools

import jax
import jax.numpy as jnp
from jax.experimental import pallas as pl
from jax.experimental.pallas import tpu as pltpu


# ----------------------------- helpers ---------------------------------------

def _round_up(x, m):
    return (x + m - 1) // m * m


def _lowbias32(x):
    """Cheap 32-bit integer mixer (lowbias32). x: uint32 array/scalar."""
    x = x ^ (x >> 16)
    x = x * jnp.uint32(0x7FEB352D)
    x = x ^ (x >> 15)
    x = x * jnp.uint32(0x846CA68B)
    x = x ^ (x >> 16)
    return x


# ----------------------------- kernels ----------------------------------------

def _ffn_kernel(x_ref, w1_ref, b1_ref, w2_ref, b2_ref, o_ref):
    """Eval-mode FFN: y = relu(x @ W1 + b1) @ W2 + b2  (dropout is identity)."""
    # Operands stay in their native dtype; MXU accumulates in f32.
    h = jnp.dot(x_ref[...], w1_ref[...], preferred_element_type=jnp.float32)
    h = jnp.maximum(h + b1_ref[...], 0.0)                        # bias + ReLU in f32
    y = jnp.dot(h.astype(x_ref.dtype), w2_ref[...],
                preferred_element_type=jnp.float32)
    y = y + b2_ref[...]
    o_ref[...] = y.astype(o_ref.dtype)


def _ffn_dropout_kernel(seed_ref, x_ref, w1_ref, b1_ref, w2_ref, b2_ref, o_ref,
                        *, p):
    """Training-mode FFN with inverted dropout (scale 1/(1-p)).

    The mask comes from a counter-based uint32 hash (portable; runs on TPU and
    in interpret mode).  Statistics match nn.Dropout but individual masks will
    not bit-match torch's RNG.
    """
    h = jnp.dot(x_ref[...], w1_ref[...], preferred_element_type=jnp.float32)
    h = jnp.maximum(h + b1_ref[...], 0.0)
    y = jnp.dot(h.astype(x_ref.dtype), w2_ref[...],
                preferred_element_type=jnp.float32)
    y = y + b2_ref[...]

    # --- dropout mask: hash(global element index, seed) ----------------------
    tm, C = y.shape
    i = pl.program_id(0)
    rows = jax.lax.broadcasted_iota(jnp.int32, (tm, C), 0).astype(jnp.uint32)
    cols = jax.lax.broadcasted_iota(jnp.int32, (tm, C), 1).astype(jnp.uint32)
    grow = i.astype(jnp.uint32) * jnp.uint32(tm) + rows          # global row
    gidx = grow * jnp.uint32(C) + cols                           # global element id

    key = _lowbias32(seed_ref[0].astype(jnp.uint32) ^ jnp.uint32(0x9E3779B9))
    bits = _lowbias32(gidx ^ key)
    bits = _lowbias32(bits + jnp.uint32(0x9E3779B9))

    # thr = round(p * 2^32); keep iff bits >= thr  =>  P(keep) = 1 - p (to ~2e-10).
    thr = jnp.uint32(min(int(p * 4294967296.0), 4294967295))
    keep = bits >= thr
    scale = 1.0 / (1.0 - p)
    y = jnp.where(keep, y * scale, 0.0)

    o_ref[...] = y.astype(o_ref.dtype)
    # TODO(synk): dropout mask uses an in-kernel hash PRNG, so it cannot
    # bit-match torch's RNG stream.


# ----------------------------- wrapper ----------------------------------------

def feed_forward(x, w1, b1, w2, b2, *, dropout_p=0.0, training=False, seed=0,
                 tm=256):
    """x: (B, T, C). w1: (C, 4C), b1: (4C,), w2: (4C, C), b2: (C,). Returns (B, T, C)."""
    assert 0.0 <= dropout_p < 1.0, "dropout_p must be in [0, 1)"
    B, T, C = x.shape
    H = w1.shape[1]
    M = B * T

    # Tile over the flattened token axis.  Keep tm a multiple of 8 (sublanes),
    # default 256 (multiple of 128 for v5e's 128-wide MXU), shrink for tiny M.
    tm_eff = _round_up(min(tm, _round_up(M, 8)), 8)
    Mp = _round_up(M, tm_eff)

    x2 = x.reshape(M, C)
    if Mp != M:
        x2 = jnp.pad(x2, ((0, Mp - M), (0, 0)))
    b1_2 = b1.reshape(1, H)
    b2_2 = b2.reshape(1, C)

    grid = (Mp // tm_eff,)
    out_shape = jax.ShapeDtypeStruct((Mp, C), x.dtype)

    itemsize = lambda a: a.dtype.itemsize
    cost = pl.CostEstimate(
        flops=4 * Mp * C * H,  # 2*M*C*H per matmul, two matmuls
        transcendentals=0,
        bytes_accessed=(x2.size * itemsize(x2) + w1.size * itemsize(w1)
                        + b1.size * itemsize(b1) + w2.size * itemsize(w2)
                        + b2.size * itemsize(b2) + Mp * C * itemsize(x2)),
    )
    cparams = pltpu.CompilerParams(
        dimension_semantics=("parallel",),          # independent M tiles (megacore on v7x)
        vmem_limit_bytes=48 * 1024 * 1024,          # headroom under v7x's 64 MiB physical
    )

    if training and dropout_p > 0.0:
        kernel = functools.partial(_ffn_dropout_kernel, p=float(dropout_p))
        grid_spec = pltpu.PrefetchScalarGridSpec(
            num_scalar_prefetch=1,
            grid=grid,
            in_specs=[
                pl.BlockSpec((tm_eff, C), lambda i, s: (i, 0)),
                pl.BlockSpec((C, H), lambda i, s: (0, 0)),
                pl.BlockSpec((1, H), lambda i, s: (0, 0)),
                pl.BlockSpec((H, C), lambda i, s: (0, 0)),
                pl.BlockSpec((1, C), lambda i, s: (0, 0)),
            ],
            out_specs=pl.BlockSpec((tm_eff, C), lambda i, s: (i, 0)),
        )
        seed_arr = jnp.asarray([seed], dtype=jnp.int32)
        out = pl.pallas_call(
            kernel,
            out_shape=out_shape,
            grid_spec=grid_spec,
            compiler_params=cparams,
            cost_estimate=cost,
        )(seed_arr, x2, w1, b1_2, w2, b2_2)
    else:
        grid_spec = pltpu.PrefetchScalarGridSpec(
            num_scalar_prefetch=0,
            grid=grid,
            in_specs=[
                pl.BlockSpec((tm_eff, C), lambda i: (i, 0)),
                pl.BlockSpec((C, H), lambda i: (0, 0)),
                pl.BlockSpec((1, H), lambda i: (0, 0)),
                pl.BlockSpec((H, C), lambda i: (0, 0)),
                pl.BlockSpec((1, C), lambda i: (0, 0)),
            ],
            out_specs=pl.BlockSpec((tm_eff, C), lambda i: (i, 0)),
        )
        out = pl.pallas_call(
            _ffn_kernel,
            out_shape=out_shape,
            grid_spec=grid_spec,
            compiler_params=cparams,
            cost_estimate=cost,
        )(x2, w1, b1_2, w2, b2_2)

    return out[:M].reshape(B, T, C)


# ----------------------------- demo -------------------------------------------

if __name__ == "__main__":
    # Small shapes consistent with the module: batch=2, seq=8, n_embed=32.
    B, T, C = 2, 8, 32
    H = 4 * C            # 128
    dropout_p = 0.1

    key = jax.random.PRNGKey(0)
    kx, kw1, kb1, kw2, kb2 = jax.random.split(key, 5)

    # Init mimicking PyTorch Linear default: U(-1/sqrt(fan_in), +1/sqrt(fan_in)).
    lim1 = 1.0 / (C ** 0.5)
    lim2 = 1.0 / (H ** 0.5)
    x = jax.random.normal(kx, (B, T, C), dtype=jnp.float32)
    w1 = jax.random.uniform(kw1, (C, H), minval=-lim1, maxval=lim1, dtype=jnp.float32)
    b1 = jax.random.uniform(kb1, (H,), minval=-lim1, maxval=lim1, dtype=jnp.float32)
    w2 = jax.random.uniform(kw2, (H, C), minval=-lim2, maxval=lim2, dtype=jnp.float32)
    b2 = jax.random.uniform(kb2, (C,), minval=-lim2, maxval=lim2, dtype=jnp.float32)

    # Eval-mode forward (dropout == identity), matching PyTorch .eval() semantics.
    y = feed_forward(x, w1, b1, w2, b2, dropout_p=dropout_p, training=False)
    y = jax.block_until_ready(y)

    # Pure-JAX reference check.
    h_ref = jnp.maximum(x.reshape(-1, C) @ w1 + b1, 0.0)
    y_ref = (h_ref @ w2 + b2).reshape(B, T, C)
    assert jnp.allclose(y, y_ref, atol=1e-5, rtol=1e-5), "eval mismatch vs reference"

    # Training-mode (dropout) path: kept elements must equal eval output / (1-p).
    y_train = feed_forward(x, w1, b1, w2, b2, dropout_p=dropout_p,
                           training=True, seed=0)
    y_train = jax.block_until_ready(y_train)

    kept = y_train != 0.0
    scale = 1.0 / (1.0 - dropout_p)
    assert jnp.allclose(jnp.where(kept, y_train, 0.0),
                        jnp.where(kept, y * scale, 0.0),
                        atol=1e-5, rtol=1e-5), "dropout kept-value mismatch"
    drop_frac = 1.0 - jnp.mean(kept.astype(jnp.float32))
    assert 0.0 < float(drop_frac) < 0.5, "dropout mask looks degenerate"

    print("KERNEL_OK")
</pallas_src>

<mosaic_0001>
module attributes {stable_mosaic.version = 11 : i64} {
  func.func @_ffn_kernel(%arg0: i32, %arg1: memref<16x32xf32, #tpu.memory_space<vmem>>, %arg2: memref<32x128xf32, #tpu.memory_space<vmem>>, %arg3: memref<1x128xf32, #tpu.memory_space<vmem>>, %arg4: memref<128x32xf32, #tpu.memory_space<vmem>>, %arg5: memref<1x32xf32, #tpu.memory_space<vmem>>, %arg6: memref<16x32xf32, #tpu.memory_space<vmem>>) attributes {dimension_semantics = [#tpu.dimension_semantics<parallel>], iteration_bounds = array<i64: 1>, scalar_prefetch = 0 : i64, scratch_operands = 0 : i64, tpu.core_type = #tpu.core_type<tc>, window_params = [{transform_indices = @transform_0, window_bounds = array<i64: 16, 32>}, {pipeline_mode = #tpu.pipeline_mode<synchronous>, transform_indices = @transform_1, window_bounds = array<i64: 32, 128>}, {pipeline_mode = #tpu.pipeline_mode<synchronous>, transform_indices = @transform_2, window_bounds = array<i64: 1, 128>}, {pipeline_mode = #tpu.pipeline_mode<synchronous>, transform_indices = @transform_3, window_bounds = array<i64: 128, 32>}, {pipeline_mode = #tpu.pipeline_mode<synchronous>, transform_indices = @transform_4, window_bounds = array<i64: 1, 32>}, {transform_indices = @transform_5, window_bounds = array<i64: 16, 32>}]} {
    %c0 = arith.constant 0 : index
    %c0_0 = arith.constant 0 : index
    %0 = vector.load %arg1[%c0, %c0_0] : memref<16x32xf32, #tpu.memory_space<vmem>>, vector<16x32xf32>
    %c0_1 = arith.constant 0 : index
    %c0_2 = arith.constant 0 : index
    %1 = vector.load %arg2[%c0_1, %c0_2] : memref<32x128xf32, #tpu.memory_space<vmem>>, vector<32x128xf32>
    %cst = arith.constant dense<0.000000e+00> : vector<16x128xf32>
    %2 = tpu.matmul %0, %1, %cst {dimension_numbers = #tpu.dot_dimension_numbers<[1], [0], [0], [1], [0, 0, 1, 1], [], []>} : vector<16x32xf32>, vector<32x128xf32>, vector<16x128xf32> -> vector<16x128xf32>
    %c0_3 = arith.constant 0 : index
    %c0_4 = arith.constant 0 : index
    %3 = vector.load %arg3[%c0_3, %c0_4] : memref<1x128xf32, #tpu.memory_space<vmem>>, vector<1x128xf32>
    %4 = vector.broadcast %3 : vector<1x128xf32> to vector<16x128xf32>
    %5 = arith.addf %2, %4 : vector<16x128xf32>
    %cst_5 = arith.constant 0.000000e+00 : f32
    %6 = vector.broadcast %cst_5 : f32 to vector<16x128xf32>
    %7 = arith.maximumf %5, %6 : vector<16x128xf32>
    %c0_6 = arith.constant 0 : index
    %c0_7 = arith.constant 0 : index
    %8 = vector.load %arg4[%c0_6, %c0_7] : memref<128x32xf32, #tpu.memory_space<vmem>>, vector<128x32xf32>
    %cst_8 = arith.constant dense<0.000000e+00> : vector<16x32xf32>
    %9 = tpu.matmul %7, %8, %cst_8 {dimension_numbers = #tpu.dot_dimension_numbers<[1], [0], [0], [1], [0, 0, 1, 1], [], []>} : vector<16x128xf32>, vector<128x32xf32>, vector<16x32xf32> -> vector<16x32xf32>
    %c0_9 = arith.constant 0 : index
    %c0_10 = arith.constant 0 : index
    %10 = vector.load %arg5[%c0_9, %c0_10] : memref<1x32xf32, #tpu.memory_space<vmem>>, vector<1x32xf32>
    %11 = vector.broadcast %10 : vector<1x32xf32> to vector<16x32xf32>
    %12 = arith.addf %9, %11 : vector<16x32xf32>
    %c0_11 = arith.constant 0 : index
    %c0_12 = arith.constant 0 : index
    %13 = vector.load %arg6[%c0_11, %c0_12] : memref<16x32xf32, #tpu.memory_space<vmem>>, vector<16x32xf32>
    tpu.vector_store %arg6[%c0_11, %c0_12], %12 {strides = array<i32>} : memref<16x32xf32, #tpu.memory_space<vmem>>, vector<16x32xf32>,
    return
  }
  func.func @transform_0(%arg0: i32) -> (i32, i32) {
    %c0_i32 = arith.constant 0 : i32
    %c0_i32_0 = arith.constant 0 : i32
    return %arg0, %c0_i32 : i32, i32
  }
  func.func @transform_1(%arg0: i32) -> (i32, i32) {
    %c0_i32 = arith.constant 0 : i32
    %c0_i32_0 = arith.constant 0 : i32
    %c0_i32_1 = arith.constant 0 : i32
    return %c0_i32, %c0_i32_0 : i32, i32
  }
  func.func @transform_2(%arg0: i32) -> (i32, i32) {
    %c0_i32 = arith.constant 0 : i32
    %c0_i32_0 = arith.constant 0 : i32
    %c0_i32_1 = arith.constant 0 : i32
    return %c0_i32, %c0_i32_0 : i32, i32
  }
  func.func @transform_3(%arg0: i32) -> (i32, i32) {
    %c0_i32 = arith.constant 0 : i32
    %c0_i32_0 = arith.constant 0 : i32
    %c0_i32_1 = arith.constant 0 : i32
    return %c0_i32, %c0_i32_0 : i32, i32
  }
  func.func @transform_4(%arg0: i32) -> (i32, i32) {
    %c0_i32 = arith.constant 0 : i32
    %c0_i32_0 = arith.constant 0 : i32
    %c0_i32_1 = arith.constant 0 : i32
    return %c0_i32, %c0_i32_0 : i32, i32
  }
  func.func @transform_5(%arg0: i32) -> (i32, i32) {
    %c0_i32 = arith.constant 0 : i32
    %c0_i32_0 = arith.constant 0 : i32
    return %arg0, %c0_i32 : i32, i32
  }
}

</mosaic_0001>

<bundles_post_ra>
// kernel: tpu_custom_call.1
= control target key start
LH: loop header
LB: loop body
LE: loop exit
PB: predicated region body
PF: predicated region fallthrough
CT: control target
= control target key end

     0   :  { %vm34_vm0 = vcmask 261120   ;;  %s445_s0 = inlined_call_operand.vmem [shape: f32[16,32], index: 0, kind: input, shape index: {}]   ;;  %s446_s1 = inlined_call_operand.vmem [shape: f32[32,128], index: 1, kind: input, shape index: {}]   ;;  %s447_s2 = inlined_call_operand.vmem [shape: f32[1,128], index: 2, kind: input, shape index: {}]   ;;  %s448_s3 = inlined_call_operand.vmem [shape: f32[128,32], index: 3, kind: input, shape index: {}]   ;;  %s449_s4 = inlined_call_operand.vmem [shape: f32[1,32], index: 4, kind: input, shape index: {}]   ;;  %s450_s5 = inlined_call_operand.hbm [shape: f32[16,32], index: 5, kind: output, shape index: {}]  }
   0x1   :  { %v26_v0 = vld [vmem:[%s446_s1 + $0x18] sm:$0xff]  ;;  %v25_v1 = vld [vmem:[%s446_s1 + $0x10] sm:$0xff]  ;;  %v21_v2 = vld [vmem:[%s445_s0] sm:$0xff] }
   0x2   :  { %262 = vmatprep.subr.mxu0 %v26_v0  ;;  %v24_v3 = vld [vmem:[%s446_s1 + $0x8] sm:$0xff]  ;;  %270 = vmatprep.mubr.msk.f32.mxu0 %vm34_vm0, %v21_v2  ;;  %v133_v4 = vld [vmem:[%s448_s3 + $0x78] sm:$0xff]  ;;  %v132_v5 = vld [vmem:[%s448_s3 + $0x70] sm:$0xff] }
   0x3   :  { %263 = vmatpush3.msra.mxu0 %v26_v0  ;;  %273 = vmatprep.subr.mxu1 %v133_v4  ;;  %v23_v6 = vld [vmem:[%s446_s1] sm:$0xff]  ;;  %v131_v7 = vld [vmem:[%s448_s3 + $0x68] sm:$0xff] }
   0x4   :  { %264 = vmatprep.subr.mxu0 %v25_v1  ;;  %274 = vmatpush3.msra.mxu1 %v133_v4  ;;  %v22_v8 = vld [vmem:[%s445_s0 + $0x8] sm:$0xff]  ;;  %v130_v9 = vld [vmem:[%s448_s3 + $0x60] sm:$0xff] }
   0x5   :  { %265 = vmatpush3.msra.mxu0 %v25_v1  ;;  %275 = vmatprep.subr.mxu1 %v132_v5 }
   0x6   :  { %266 = vmatprep.subr.mxu0 %v24_v3  ;;  %276 = vmatpush3.msra.mxu1 %v132_v5 }
   0x7   :  { %267 = vmatpush3.msra.mxu0 %v24_v3 }
   0x8   :  { %10 = vsyncpa [#allocation3], 0  ;;  %268 = vmatprep.subr.mxu0 %v23_v6  ;;  %277 = vmatprep.subr.mxu1 %v131_v7  ;;  %v129_v10 = vld [vmem:[%s448_s3 + $0x58] sm:$0xff]  ;;  %v128_v11 = vld [vmem:[%s448_s3 + $0x50] sm:$0xff] }
   0x9   :  { %269 = vmatpush3.msra.mxu0 %v23_v6  ;;  %278 = vmatpush3.msra.mxu1 %v131_v7  ;;  %v127_v12 = vld [vmem:[%s448_s3 + $0x48] sm:$0xff]  ;;  %v126_v13 = vld [vmem:[%s448_s3 + $0x40] sm:$0xff]  ;;  %v125_v14 = vld [vmem:[%s448_s3 + $0x38] sm:$0xff] }
   0xa   :  { %271 = vmatmul.mubr.msk.f32.vlgmr.msra.gmra.mxu0 %vm34_vm0, %v22_v8  ;;  %279 = vmatprep.subr.mxu1 %v130_v9  ;;  %v124_v15 = vld [vmem:[%s448_s3 + $0x30] sm:$0xff]  ;;  %v123_v16 = vld [vmem:[%s448_s3 + $0x28] sm:$0xff]  ;;  %v122_v17 = vld [vmem:[%s448_s3 + $0x20] sm:$0xff] }
   0xb   :  { %280 = vmatpush3.msra.mxu1 %v130_v9  ;;  %v121_v18 = vld [vmem:[%s448_s3 + $0x18] sm:$0xff]  ;;  %v120_v19 = vld [vmem:[%s448_s3 + $0x10] sm:$0xff]  ;;  %v119_v20 = vld [vmem:[%s448_s3 + $0x8] sm:$0xff] }
   0xc   :  { %281 = vmatprep.subr.mxu1 %v129_v10  ;;  %v118_v21 = vld [vmem:[%s448_s3] sm:$0xff]  ;;  %s333_s3 = smov [#allocation2]  }
   0xd   :  { %282 = vmatpush3.msra.mxu1 %v129_v10  ;;  %v234_v22 = vld [vmem:[%s447_s2] ss:$0 sm:$0xff]  ;;  %s223_s13 = sshll.u32 %s333_s3, 4  ;;  %s224_s13 = int_to_ptr.vmem [resolvable:$true] %s223_s13 }
   0xe   :  { %283 = vmatprep.subr.mxu1 %v128_v11  ;;  %v237_v29 = vld [vmem:[%s449_s4] ss:$0 sm:$0xff]  ;;  %s311_s2 = scalar_lea.vmem %s224_s13, 256  ;;  %p316_p1 = scmp.lt.s32.totalorder %s224_s13, %s224_s13 }
   0xf   :  { %284 = vmatpush3.msra.mxu1 %v128_v11  ;;  %p312_p0 = scmp.ne.s32.totalorder %s224_s13, %s311_s2  ;;  %p317_p2 = scmp.lt.s32.totalorder %s311_s2, %s311_s2 }
  0x10   :  { %285 = vmatprep.subr.mxu1 %v127_v12 }
  0x11   :  { %286 = vmatpush3.msra.mxu1 %v127_v12  ;;  %p318_p3 = por %p317_p2, %p316_p1 }
  0x12   :  { %287 = vmatprep.subr.mxu1 %v126_v13 }
  0x13   :  { %288 = vmatpush3.msra.mxu1 %v126_v13  ;;  %p319_p4 = pnand %p318_p3, %p312_p0 }
  0x14   :  { %289 = vmatprep.subr.mxu1 %v125_v14 }
  0x15   :  { %290 = vmatpush3.msra.mxu1 %v125_v14 }
  0x16   :  { %291 = vmatprep.subr.mxu1 %v124_v15 }
  0x17   :  { %292 = vmatpush3.msra.mxu1 %v124_v15 }
  0x18   :  { %293 = vmatprep.subr.mxu1 %v123_v16 }
  0x19   :  { %294 = vmatpush3.msra.mxu1 %v123_v16 }
  0x1a   :  { %295 = vmatprep.subr.mxu1 %v122_v17 }
  0x1b   :  { %296 = vmatpush3.msra.mxu1 %v122_v17 }
  0x1c   :  { %297 = vmatprep.subr.mxu1 %v121_v18 }
  0x1d   :  { %298 = vmatpush3.msra.mxu1 %v121_v18 }
  0x1e   :  { %299 = vmatprep.subr.mxu1 %v120_v19 }
  0x1f   :  { %300 = vmatpush3.msra.mxu1 %v120_v19 }
  0x20   :  { %301 = vmatprep.subr.mxu1 %v119_v20 }
  0x21   :  { %302 = vmatpush3.msra.mxu1 %v119_v20 }
  0x22   :  { %303 = vmatprep.subr.mxu1 %v118_v21 }
  0x23   :  { %304 = vmatpush3.msra.mxu1 %v118_v21 }
  0xca   :  { %v272_v23 = vpop.f32.mrf.mxu0 }
  0xcb   :  { %v113_v24 = vadd.f32 %v272_v23, %v234_v22 }
  0xcc   :  { %v107_v25 = vpop.f32.mrf.mxu0 }
  0xcd   :  { %v108_v26 = vadd.f32 %v234_v22, %v107_v25  ;;  %v117_v28 = vmax.f32 %v113_v24, 0.0 }
  0xcf   :  { %v116_v27 = vmax.f32 %v108_v26, 0.0 }
  0xd1   :  { %305 = vmatprep.mubr.f32.mxu1 %v116_v27 }
  0xd2   :  { %306 = vmatmul.mubr.f32.vlgmr.msra.gmra.mxu1 %v117_v28 }
 0x192   :  { %v307_v30 = vpop.f32.mrf.mxu1 }
 0x193   :  { %v213_v31 = vadd.f32 %v307_v30, %v237_v29 }
 0x194   :  { %v207_v32 = vpop.f32.mrf.mxu1 }
 0x195   :  { %217 = vst.msk [vmem:[#allocation2 + $0x8] sm:$0xff] %vm34_vm0, %v213_v31  ;;  %v208_v33 = vadd.f32 %v237_v29, %v207_v32 }
 0x197   :  { %216 = vst.msk [vmem:[#allocation2] sm:$0xff] %vm34_vm0, %v208_v33 }
 0x198   :  { %322 = shalt.err (!%p319_p4)
}
 0x199   :  { %s334_s14 = smov 128   ;;  %s335_s4 = smov 8  }
 0x19a   :  { %229 = dma.vmem_to_hbm [thread:$0]  %s224_s13, 256, %s450_s5, [#allocation3], %s334_s14, %s334_s14, %s335_s4  }
 0x19b   :  { %331 = dma.done.wait [#allocation3], 256  }
 0x19c   :  { %332 = vsyncadd [#allocation3], 4294967040 }
 0x19d   :  { %233 = vsyncpa [#allocation3], 1 }

</bundles_post_ra>
